<compile_context>
chip_gen: v7x
topology: tpu7x:2x2x1
jax: 0.10.0
libtpu: 0.0.40
codegen_flags: <defaults>
</compile_context>

<pallas_src>
import jax
import jax.numpy as jnp
from jax.experimental import pallas as pl
from jax.experimental.pallas import tpu as pltpu


def ta_kernel(x_ref, xe_ref, w1x_ref, w1e_ref, b1_ref, w2_ref, out_ref):
    # Per-grid-step shapes:
    #   x_ref  : (BB, T, D)     xe_ref : (BB, T, H)
    #   w1x_ref: (D, SA)        w1e_ref: (H, SA)     b1_ref: (1, SA)
    #   w2_ref : (1, SA)        out_ref: (BB, H)
    BB, T, D = x_ref.shape
    H = xe_ref.shape[2]
    SA = w1x_ref.shape[1]

    xe = xe_ref[...]                                   # (BB, T, H)
    x_flat = x_ref[...].reshape(BB * T, D)             # (BB*T, D)
    xe_flat = xe.reshape(BB * T, H)                    # (BB*T, H)

    # attn_layer[0] (Linear on concat([X, X_encoded])) == split matmuls,
    # fed with BB*T rows so the MXU systolic array is actually filled.
    h = jnp.tanh(
        jnp.dot(x_flat, w1x_ref[...], preferred_element_type=jnp.float32)
        + jnp.dot(xe_flat, w1e_ref[...], preferred_element_type=jnp.float32)
        + b1_ref[...]
    )                                                  # (BB*T, SA)

    # attn_layer[2] (Linear SA -> 1): broadcast-mul + lane reduce on the VPU/XLU
    # instead of an N=1 MXU matmul.  b2 omitted (cancels in softmax).
    h3 = h.reshape(BB, T, SA)                          # (BB, T, SA)
    s = jnp.sum(h3 * w2_ref[...], axis=-1)             # (BB, T)

    # softmax over the T axis (dim=1 of the (B, T) scores in the torch code)
    m = jnp.max(s, axis=1, keepdims=True)              # (BB, 1)
    e = jnp.exp(s - m)                                 # (BB, T)
    inv = pl.reciprocal(jnp.sum(e, axis=1, keepdims=True), approx=True)
    beta = e * inv                                     # (BB, T)

    # context = bmm(beta[:, None, :], X_encoded)[:, 0, :] -> sum_t beta_t * xe_t
    ctx = jnp.sum(beta[:, :, None] * xe, axis=1)       # (BB, H)
    out_ref[...] = ctx.astype(out_ref.dtype)


def ta_forward(X_encoded, X, params, block_b=None):
    """Pallas implementation of TA.forward(X_encoded, X) -> (B, TA_hidden)."""
    B, T, H = X_encoded.shape
    _, _, D = X.shape
    w1, b1, w2 = params["w1"], params["b1"], params["w2"]
    SA = w1.shape[0]

    # Batch-block size: as large as practical.  If B is small, take all of it
    # (block == full dim satisfies the (8,128) tiling rule); otherwise use a
    # multiple of 8 so the (BB, H) output block tiles cleanly, and leave >=2
    # grid steps so both v7x TensorCores get work.
    if block_b is None:
        block_b = B if B <= 512 else 512
    BB = block_b
    grid_b = pl.cdiv(B, BB)

    # cat order is (X, X_encoded): first D input columns of w1 hit X,
    # the remaining H columns hit X_encoded.
    w1x_t = jnp.transpose(w1[:, :D])          # (D, SA)
    w1e_t = jnp.transpose(w1[:, D:])          # (H, SA)
    b1_2d = b1.reshape(1, SA)                 # (1, SA)
    w2_row = w2.reshape(1, SA)                # (1, SA)
    # TODO(synk): on v6e/v7x, cast X / X_encoded / w1 blocks to bf16 for the
    # matmuls (keep f32 accumulation + softmax) to halve HBM traffic; kept f32
    # here so the same kernel stays efficient on v5e (no bf16 VPU/EUP).

    out = pl.pallas_call(
        ta_kernel,
        out_shape=jax.ShapeDtypeStruct((B, H), jnp.float32),
        grid_spec=pltpu.PrefetchScalarGridSpec(
            num_scalar_prefetch=0,
            grid=(grid_b,),
            in_specs=[
                pl.BlockSpec((BB, T, D), lambda b: (b, 0, 0)),   # X
                pl.BlockSpec((BB, T, H), lambda b: (b, 0, 0)),   # X_encoded
                pl.BlockSpec((D, SA), lambda b: (0, 0)),         # w1 (X cols, transposed)
                pl.BlockSpec((H, SA), lambda b: (0, 0)),         # w1 (X_enc cols, transposed)
                pl.BlockSpec((1, SA), lambda b: (0, 0)),         # b1
                pl.BlockSpec((1, SA), lambda b: (0, 0)),         # w2 as a row vector
            ],
            out_specs=pl.BlockSpec((BB, H), lambda b: (b, 0)),
        ),
        compiler_params=pltpu.CompilerParams(
            dimension_semantics=("parallel",),
        ),
    )(X, X_encoded, w1x_t, w1e_t, b1_2d, w2_row)

    return out


def ta_forward_ref(X_encoded, X, params):
    """Pure-JAX reference of the torch forward for verification."""
    x = jnp.concatenate([X, X_encoded], axis=2)                   # (B, T, D+H)
    h = jnp.tanh(x @ params["w1"].T + params["b1"])               # (B, T, SA)
    s = (h @ params["w2"].T + params["b2"])[..., 0]               # (B, T)
    beta = jax.nn.softmax(s, axis=1)                              # (B, T)
    return jnp.einsum("bt,bth->bh", beta, X_encoded)              # (B, H)


def init_params(key, dim, TA_num_hidden, SA_num_hidden):
    # Only attn_layer participates in forward(); lstm_layer / fc / fc_final are
    # dead in this forward pass, so they are not materialized.
    k1, k2, k3, k4 = jax.random.split(key, 4)
    in1 = TA_num_hidden + dim
    lim1 = 1.0 / jnp.sqrt(in1)
    lim2 = 1.0 / jnp.sqrt(SA_num_hidden)
    return {
        "w1": jax.random.uniform(k1, (SA_num_hidden, in1), jnp.float32, -lim1, lim1),
        "b1": jax.random.uniform(k2, (SA_num_hidden,), jnp.float32, -lim1, lim1),
        "w2": jax.random.uniform(k3, (1, SA_num_hidden), jnp.float32, -lim2, lim2),
        "b2": jax.random.uniform(k4, (1,), jnp.float32, -lim2, lim2),
    }


if __name__ == "__main__":
    B, T = 2, 8
    dim = 4                # X.shape[2]
    TA_num_hidden = 32     # X_encoded feature size
    SA_num_hidden = 32

    key = jax.random.PRNGKey(0)
    kx, kxe, kp = jax.random.split(key, 3)
    X = jax.random.normal(kx, (B, T, dim), jnp.float32)
    X_encoded = jax.random.normal(kxe, (B, T, TA_num_hidden), jnp.float32)
    params = init_params(kp, dim, TA_num_hidden, SA_num_hidden)

    ctx = ta_forward(X_encoded, X, params)
    ctx = jax.block_until_ready(ctx)

    ref = ta_forward_ref(X_encoded, X, params)
    assert ctx.shape == (B, TA_num_hidden)
    assert jnp.allclose(ctx, ref, rtol=1e-2, atol=1e-2), "mismatch vs reference"

    print("KERNEL_OK")
</pallas_src>

<mosaic_0001>
module attributes {stable_mosaic.version = 11 : i64} {
  func.func @ta_kernel(%arg0: i32, %arg1: memref<2x8x4xf32, #tpu.memory_space<vmem>>, %arg2: memref<2x8x32xf32, #tpu.memory_space<vmem>>, %arg3: memref<4x32xf32, #tpu.memory_space<vmem>>, %arg4: memref<32x32xf32, #tpu.memory_space<vmem>>, %arg5: memref<1x32xf32, #tpu.memory_space<vmem>>, %arg6: memref<1x32xf32, #tpu.memory_space<vmem>>, %arg7: memref<2x32xf32, #tpu.memory_space<vmem>>) attributes {dimension_semantics = [#tpu.dimension_semantics<parallel>], iteration_bounds = array<i64: 1>, scalar_prefetch = 0 : i64, scratch_operands = 0 : i64, tpu.core_type = #tpu.core_type<tc>, window_params = [{transform_indices = @transform_0, window_bounds = array<i64: 2, 8, 4>}, {transform_indices = @transform_1, window_bounds = array<i64: 2, 8, 32>}, {pipeline_mode = #tpu.pipeline_mode<synchronous>, transform_indices = @transform_2, window_bounds = array<i64: 4, 32>}, {pipeline_mode = #tpu.pipeline_mode<synchronous>, transform_indices = @transform_3, window_bounds = array<i64: 32, 32>}, {pipeline_mode = #tpu.pipeline_mode<synchronous>, transform_indices = @transform_4, window_bounds = array<i64: 1, 32>}, {pipeline_mode = #tpu.pipeline_mode<synchronous>, transform_indices = @transform_5, window_bounds = array<i64: 1, 32>}, {transform_indices = @transform_6, window_bounds = array<i64: 2, 32>}]} {
    %c0 = arith.constant 0 : index
    %c0_0 = arith.constant 0 : index
    %c0_1 = arith.constant 0 : index
    %0 = vector.load %arg2[%c0, %c0_0, %c0_1] : memref<2x8x32xf32, #tpu.memory_space<vmem>>, vector<2x8x32xf32>
    %c0_2 = arith.constant 0 : index
    %c0_3 = arith.constant 0 : index
    %c0_4 = arith.constant 0 : index
    %1 = vector.load %arg1[%c0_2, %c0_3, %c0_4] : memref<2x8x4xf32, #tpu.memory_space<vmem>>, vector<2x8x4xf32>
    %2 = vector.shape_cast %1 : vector<2x8x4xf32> to vector<16x4xf32>
    %3 = vector.shape_cast %0 : vector<2x8x32xf32> to vector<16x32xf32>
    %c0_5 = arith.constant 0 : index
    %c0_6 = arith.constant 0 : index
    %4 = vector.load %arg3[%c0_5, %c0_6] : memref<4x32xf32, #tpu.memory_space<vmem>>, vector<4x32xf32>
    %cst = arith.constant dense<0.000000e+00> : vector<16x32xf32>
    %5 = tpu.matmul %2, %4, %cst {dimension_numbers = #tpu.dot_dimension_numbers<[1], [0], [0], [1], [0, 0, 1, 1], [], []>} : vector<16x4xf32>, vector<4x32xf32>, vector<16x32xf32> -> vector<16x32xf32>
    %c0_7 = arith.constant 0 : index
    %c0_8 = arith.constant 0 : index
    %6 = vector.load %arg4[%c0_7, %c0_8] : memref<32x32xf32, #tpu.memory_space<vmem>>, vector<32x32xf32>
    %cst_9 = arith.constant dense<0.000000e+00> : vector<16x32xf32>
    %7 = tpu.matmul %3, %6, %cst_9 {dimension_numbers = #tpu.dot_dimension_numbers<[1], [0], [0], [1], [0, 0, 1, 1], [], []>} : vector<16x32xf32>, vector<32x32xf32>, vector<16x32xf32> -> vector<16x32xf32>
    %8 = arith.addf %5, %7 : vector<16x32xf32>
    %c0_10 = arith.constant 0 : index
    %c0_11 = arith.constant 0 : index
    %9 = vector.load %arg5[%c0_10, %c0_11] : memref<1x32xf32, #tpu.memory_space<vmem>>, vector<1x32xf32>
    %10 = vector.broadcast %9 : vector<1x32xf32> to vector<16x32xf32>
    %11 = arith.addf %8, %10 : vector<16x32xf32>
    %12 = math.tanh %11 : vector<16x32xf32>
    %13 = vector.shape_cast %12 : vector<16x32xf32> to vector<2x8x32xf32>
    %c0_12 = arith.constant 0 : index
    %c0_13 = arith.constant 0 : index
    %14 = vector.load %arg6[%c0_12, %c0_13] : memref<1x32xf32, #tpu.memory_space<vmem>>, vector<1x32xf32>
    %15 = vector.shape_cast %14 : vector<1x32xf32> to vector<1x1x32xf32>
    %16 = vector.broadcast %15 : vector<1x1x32xf32> to vector<2x8x32xf32>
    %17 = arith.mulf %13, %16 : vector<2x8x32xf32>
    %cst_14 = arith.constant dense<0.000000e+00> : vector<2x8xf32>
    %18 = vector.multi_reduction <add>, %17, %cst_14 [2] : vector<2x8x32xf32> to vector<2x8xf32>
    %cst_15 = arith.constant dense<0xFF800000> : vector<2xf32>
    %19 = vector.multi_reduction <maximumf>, %18, %cst_15 [1] : vector<2x8xf32> to vector<2xf32>
    %20 = vector.shape_cast %19 : vector<2xf32> to vector<2x1xf32>
    %21 = vector.broadcast %20 : vector<2x1xf32> to vector<2x8xf32>
    %22 = arith.subf %18, %21 : vector<2x8xf32>
    %23 = math.exp %22 : vector<2x8xf32>
    %cst_16 = arith.constant dense<0.000000e+00> : vector<2xf32>
    %24 = vector.multi_reduction <add>, %23, %cst_16 [1] : vector<2x8xf32> to vector<2xf32>
    %25 = vector.shape_cast %24 : vector<2xf32> to vector<2x1xf32>
    %26 = tpu.reciprocal %25 {approx = true} : vector<2x1xf32> -> vector<2x1xf32>
    %27 = vector.broadcast %26 : vector<2x1xf32> to vector<2x8xf32>
    %28 = arith.mulf %23, %27 : vector<2x8xf32>
    %29 = vector.shape_cast %28 : vector<2x8xf32> to vector<2x8x1xf32>
    %30 = vector.broadcast %29 : vector<2x8x1xf32> to vector<2x8x32xf32>
    %31 = arith.mulf %30, %0 : vector<2x8x32xf32>
    %cst_17 = arith.constant dense<0.000000e+00> : vector<2x32xf32>
    %32 = vector.multi_reduction <add>, %31, %cst_17 [1] : vector<2x8x32xf32> to vector<2x32xf32>
    %c0_18 = arith.constant 0 : index
    %c0_19 = arith.constant 0 : index
    %33 = vector.load %arg7[%c0_18, %c0_19] : memref<2x32xf32, #tpu.memory_space<vmem>>, vector<2x32xf32>
    tpu.vector_store %arg7[%c0_18, %c0_19], %32 {strides = array<i32>} : memref<2x32xf32, #tpu.memory_space<vmem>>, vector<2x32xf32>,
    return
  }
  func.func @transform_0(%arg0: i32) -> (i32, i32, i32) {
    %c0_i32 = arith.constant 0 : i32
    %c0_i32_0 = arith.constant 0 : i32
    %c0_i32_1 = arith.constant 0 : i32
    return %arg0, %c0_i32, %c0_i32_0 : i32, i32, i32
  }
  func.func @transform_1(%arg0: i32) -> (i32, i32, i32) {
    %c0_i32 = arith.constant 0 : i32
    %c0_i32_0 = arith.constant 0 : i32
    %c0_i32_1 = arith.constant 0 : i32
    return %arg0, %c0_i32, %c0_i32_0 : i32, i32, i32
  }
  func.func @transform_2(%arg0: i32) -> (i32, i32) {
    %c0_i32 = arith.constant 0 : i32
    %c0_i32_0 = arith.constant 0 : i32
    %c0_i32_1 = arith.constant 0 : i32
    return %c0_i32, %c0_i32_0 : i32, i32
  }
  func.func @transform_3(%arg0: i32) -> (i32, i32) {
    %c0_i32 = arith.constant 0 : i32
    %c0_i32_0 = arith.constant 0 : i32
    %c0_i32_1 = arith.constant 0 : i32
    return %c0_i32, %c0_i32_0 : i32, i32
  }
  func.func @transform_4(%arg0: i32) -> (i32, i32) {
    %c0_i32 = arith.constant 0 : i32
    %c0_i32_0 = arith.constant 0 : i32
    %c0_i32_1 = arith.constant 0 : i32
    return %c0_i32, %c0_i32_0 : i32, i32
  }
  func.func @transform_5(%arg0: i32) -> (i32, i32) {
    %c0_i32 = arith.constant 0 : i32
    %c0_i32_0 = arith.constant 0 : i32
    %c0_i32_1 = arith.constant 0 : i32
    return %c0_i32, %c0_i32_0 : i32, i32
  }
  func.func @transform_6(%arg0: i32) -> (i32, i32) {
    %c0_i32 = arith.constant 0 : i32
    %c0_i32_0 = arith.constant 0 : i32
    return %arg0, %c0_i32 : i32, i32
  }
}

</mosaic_0001>

<bundles_post_ra>
// kernel: tpu_custom_call.1
= control target key start
LH: loop header
LB: loop body
LE: loop exit
PB: predicated region body
PF: predicated region fallthrough
CT: control target
= control target key end

     0   :  { %11 = vsyncpa [#allocation3], 0  ;;  %s628_s0 = inlined_call_operand.vmem [shape: f32[2,8,4], index: 0, kind: input, shape index: {}]   ;;  %s629_s1 = inlined_call_operand.hbm [shape: f32[2,8,32], index: 1, kind: input, shape index: {}]   ;;  %s630_s2 = inlined_call_operand.hbm [shape: f32[4,32], index: 2, kind: input, shape index: {}]   ;;  %s631_s3 = inlined_call_operand.vmem [shape: f32[32,32], index: 3, kind: input, shape index: {}]   ;;  %s632_s4 = inlined_call_operand.vmem [shape: f32[1,32], index: 4, kind: input, shape index: {}]   ;;  %s633_s5 = inlined_call_operand.vmem [shape: f32[1,32], index: 5, kind: input, shape index: {}]   ;;  %s634_s6 = inlined_call_operand.hbm [shape: f32[2,32], index: 6, kind: output, shape index: {}]  }
   0x1   :  { %12 = vsyncpa [#allocation6], 0 }
   0x2   :  { %13 = vsyncpa [#allocation4], 0  ;;  %s504_s21 = smov [#allocation2]   ;;  %s432_s25 = scalar_lea.hbm %s629_s1, 256 }
   0x3   :  { %s21_s22 = sshll.u32 %s504_s21, 4  ;;  %p433_p0 = scmp.ne.s32.totalorder %s629_s1, %s432_s25  ;;  %s22_s22 = int_to_ptr.vmem [resolvable:$true] %s21_s22 }
   0x4   :  { %p436_p1 = scmp.lt.u32.totalorder %s432_s25, %s629_s1 }
   0x6   :  { %p438_p2 = pnand %p436_p1, %p433_p0 }
   0x8   :  { %441 = shalt.err (!%p438_p2)
}
   0x9   :  { %s442_s30 = scalar_lea.vmem %s22_s22, 256  ;;  %p447_p4 = scmp.lt.s32.totalorder %s22_s22, %s22_s22 }
   0xa   :  { %p443_p3 = scmp.ne.s32.totalorder %s22_s22, %s442_s30  ;;  %p448_p5 = scmp.lt.s32.totalorder %s442_s30, %s442_s30 }
   0xc   :  { %p449_p6 = por %p448_p5, %p447_p4 }
   0xe   :  { %p450_p7 = pnand %p449_p6, %p443_p3 }
  0x10   :  { %453 = shalt.err (!%p450_p7)
}
  0x11   :  { %s505_s7 = smov 128   ;;  %s506_s8 = smov 8  }
  0x12   :  { %27 = dma.hbm_to_vmem [thread:$0]  %s629_s1, 256, %s22_s22, [#allocation3], %s505_s7, %s505_s7, %s506_s8  }
  0x13   :  { %s507_s11 = smov [#allocation5]   ;;  %s454_s15 = scalar_lea.hbm %s630_s2, 64 }
  0x14   :  { %s34_s12 = sshll.u32 %s507_s11, 4  ;;  %p455_p8 = scmp.ne.s32.totalorder %s630_s2, %s454_s15  ;;  %s35_s12 = int_to_ptr.vmem [resolvable:$true] %s34_s12 }
  0x15   :  { %p458_p9 = scmp.lt.u32.totalorder %s454_s15, %s630_s2 }
  0x17   :  { %p460_p10 = pnand %p458_p9, %p455_p8 }
  0x19   :  { %463 = shalt.err (!%p460_p10)
}
  0x1a   :  { %s464_s20 = scalar_lea.vmem %s35_s12, 64  ;;  %p469_p12 = scmp.lt.s32.totalorder %s35_s12, %s35_s12 }
  0x1b   :  { %p465_p11 = scmp.ne.s32.totalorder %s35_s12, %s464_s20  ;;  %p470_p13 = scmp.lt.s32.totalorder %s464_s20, %s464_s20 }
  0x1d   :  { %p471_p0 = por %p470_p13, %p469_p12 }
  0x1f   :  { %p472_p1 = pnand %p471_p0, %p465_p11 }
  0x21   :  { %475 = shalt.err (!%p472_p1)
}
  0x22   :  { %37 = dma.hbm_to_vmem [thread:$0]  %s630_s2, 64, %s35_s12, [#allocation6]  }
  0x23   :  { %498 = dma.done.wait [#allocation3], 256  }
  0x24   :  { %499 = vsyncadd [#allocation3], 4294967040 }
  0x25   :  { %500 = dma.done.wait [#allocation6], 64  }
  0x26   :  { %501 = vsyncadd [#allocation6], 4294967232  ;;  %vm148_vm0 = vcmask 1043456   ;;  %vm141_vm1 = vcmask 31744   ;;  %v55_v0 = vld [vmem:[%s631_s3] sm:$0xff]  ;;  %v56_v1 = vld [vmem:[%s631_s3 + $0x8] sm:$0xff]  ;;  %v255_v27 = vlaneseq }
  0x27   :  { %v57_v2 = vld [vmem:[%s631_s3 + $0x10] sm:$0xff]  ;;  %v404_v3 = vpack.c.bf16 %v56_v1, %v55_v0  ;;  %v58_v4 = vld [vmem:[%s631_s3 + $0x18] sm:$0xff]  ;;  %v52_v6 = vld [vmem:[%s628_s0] sm:$0xff]  ;;  %vm59_vm2 = vcmask 261120   ;;  %vm265_vm3 = vcmask 1041409   ;;  %vm268_vm4 = vcmask 58368  }
  0x28   :  { %v54_v5 = vld [vmem:[#allocation5] sm:$0xf]  ;;  %v408_v7 = vpack.c.bf16 %v58_v4, %v57_v2  ;;  %401 = vmatprep.mubr.msk.f32.mxu0 %vm141_vm1, %v52_v6  ;;  %v586_v8 = vld [vmem:[#allocation2] sm:$0xff]  ;;  %v53_v9 = vld [vmem:[%s628_s0 + $0x8] sm:$0xff]  ;;  %v256_v28 = vand.u32 127, %v255_v27  ;;  %v258_v29 = vshrl.u32 %v255_v27, 7 }
  0x29   :  { %399 = vmatprep.subr.msk.mxu0 %vm148_vm0, %v54_v5  ;;  %405 = vmatprep.subr.bf16.mxu1 %v404_v3  ;;  %v595_v10 = vld [vmem:[#allocation2 + $0x8] sm:$0xff]  ;;  %v377_v14 = vld [vmem:[%s632_s4] ss:$0 sm:$0xff]  ;;  %v508_v37 = vmov 0   ;;  %s509_s4 = smov [#allocation7]   ;;  %vm354_vm5 = vcmask 254976  }
  0x2a   :  { %400 = vmatpush3.msk.msra.mxu0 %vm148_vm0, %v54_v5  ;;  %407 = vmatpush3.bf16.msra.mxu1 %v404_v3  ;;  %v378_v20 = vld [vmem:[%s633_s5] ss:$0 sm:$0xff]  ;;  %v259_v31 = vsub.s32 %v256_v28, %v258_v29  ;;  %v275_v38 = vsub.s32 0, %v258_v29  ;;  %v279_v39 = vsub.s32 1, %v258_v29  ;;  %s362_s5 = sshll.u32 %s509_s4, 4  ;;  %s363_s5 = int_to_ptr.vmem [resolvable:$true] %s362_s5 }
  0x2b   :  { %396 = vmatprep.mubr.msk.f32.mxu1 %vm59_vm2, %v586_v8  ;;  %409 = vmatprep.subr.bf16.mxu1 %v408_v7  ;;  %s476_s11 = scalar_lea.vmem %s363_s5, 32  ;;  %p481_p3 = scmp.lt.s32.totalorder %s363_s5, %s363_s5 }
  0x2c   :  { %402 = vmatmul.mubr.msk.f32.vlgmr.msra.gmra.mrb[0].mxu0 %vm141_vm1, %v53_v9  ;;  %421 = vset.pattern.permute.xlu0 %v508_v37  ;;  %p477_p2 = scmp.ne.s32.totalorder %s363_s5, %s476_s11  ;;  %p482_p4 = scmp.lt.s32.totalorder %s476_s11, %s476_s11 }
  0x2d   :  { %420 = vset.pattern.permute.xlu1 %v508_v37 }
  0x2e   :  { %411 = vmatpush3.bf16.msra.mxu1 %v408_v7  ;;  %p483_p5 = por %p482_p4, %p481_p3 }
  0x30   :  { %p484_p6 = pnand %p483_p5, %p477_p2 }
  0x31   :  { %397 = vmatmul.mubr.msk.f32.vlgmr.msra.gmra.mrb[0].mxu1 %vm59_vm2, %v595_v10 }
  0xff   :  { %v403_v11 = vpop.f32.mrb[0].mxu0 }
 0x100   :  { %v218_v12 = vpop.f32.mrb[1].mxu0 }
 0x104   :  { %v398_v13 = vpop.f32.mrb[0].mxu1 }
 0x105   :  { %v224_v15 = vadd.f32 %v403_v11, %v398_v13  ;;  %v132_v16 = vpop.f32.mrb[1].mxu1 }
 0x106   :  { %v219_v17 = vadd.f32 %v218_v12, %v132_v16 }
 0x107   :  { %v235_v18 = vadd.f32 %v377_v14, %v224_v15 }
 0x108   :  { %v234_v19 = vadd.f32 %v377_v14, %v219_v17 }
 0x109   :  { %422 = vtanh.f32 %v235_v18 }
 0x10a   :  { %424 = vtanh.f32 %v234_v19 }
 0x113   :  { %v423_v21 = vpop.eup %422 }
 0x114   :  { %v425_v22 = vpop.eup %424  ;;  %v246_v25 = vmul.f32 %v423_v21, %v378_v20 }
 0x115   :  { %v245_v23 = vmul.f32 %v425_v22, %v378_v20 }
 0x116   :  { %v250_v26 = vsel %vm59_vm2, %v246_v25, 0.0 }
 0x117   :  { %v247_v24 = vsel %vm59_vm2, %v245_v23, 0.0 }
 0x118   :  { %248 = vadd.xlane.f32.xlu0 %v247_v24 }
 0x11c   :  { %251 = vadd.xlane.f32.xlu0 %v250_v26 }
 0x1a5   :  { %v249_v30 = vpop.xlane.xlu0 %248 }
 0x1a6   :  { %v260_v33 = vrot.slane %v249_v30, %v259_v31 }
 0x1a9   :  { %v252_v32 = vpop.xlane.xlu0 %251 }
 0x1aa   :  { %v264_v34 = vrot.slane %v252_v32, %v259_v31 }
 0x1ac   :  { %v266_v35 = vsel %vm265_vm3, %v264_v34, %v260_v33 }
 0x1ad   :  { %v269_v36 = vsel %vm268_vm4, %v266_v35, -inf }
 0x1ae   :  { %270 = vmax.xlane.f32.xlu1 %v269_v36 }
 0x23b   :  { %v271_v40 = vpop.xlane.xlu1 %270 }
 0x23c   :  { %v276_v41 = vrot.slane %v271_v40, %v275_v38  ;;  %v280_v42 = vrot.slane %v271_v40, %v279_v39 }
 0x23e   :  { %v283_v43 = vsub.f32 %v249_v30, %v276_v41  ;;  %v284_v44 = vsub.f32 %v252_v32, %v280_v42 }
 0x240   :  { %v285_v45 = vmul.f32 1.442695, %v283_v43  ;;  %v287_v46 = vmul.f32 1.442695, %v284_v44 }
 0x242   :  { %426 = vpow2.f32 %v285_v45 }
 0x243   :  { %428 = vpow2.f32 %v287_v46 }
 0x24c   :  { %v427_v47 = vpop.eup %426 }
 0x24d   :  { %v429_v48 = vpop.eup %428  ;;  %292 = vperm.xlu1 %420, %v427_v47  }
 0x24e   :  { %295 = vperm.xlu0 %421, %v429_v48  }
 0x2cc   :  { %v293_v49 = vpop.permute.xlu1 %292 }
 0x2cd   :  { %v296_v50 = vpop.permute.xlu0 %295  ;;  %v300_v51 = vrot.slane %v293_v49, %v259_v31 }
 0x2ce   :  { %v304_v52 = vrot.slane %v296_v50, %v259_v31 }
 0x2d0   :  { %v305_v53 = vsel %vm265_vm3, %v304_v52, %v300_v51 }
 0x2d1   :  { %v307_v54 = vsel %vm268_vm4, %v305_v53, 0.0 }
 0x2d2   :  { %308 = vadd.xlane.f32.xlu1 %v307_v54 }
 0x35f   :  { %v309_v55 = vpop.xlane.xlu1 %308 }
 0x360   :  { %430 = vrcp.f32 %v309_v55 }
 0x36a   :  { %v431_v56 = vpop.eup %430 }
 0x36b   :  { %v315_v57 = vrot.slane %v431_v56, %v275_v38  ;;  %v319_v59 = vrot.slane %v431_v56, %v279_v39 }
 0x36d   :  { %v322_v58 = vmul.f32 %v427_v47, %v315_v57  ;;  %v323_v60 = vmul.f32 %v429_v48, %v319_v59 }
 0x36f   :  { %326 = vperm.xlu0 %421, %v322_v58  }
 0x373   :  { %331 = vperm.xlu0 %421, %v323_v60  }
 0x3ee   :  { %v327_v61 = vpop.permute.xlu0 %326 }
 0x3ef   :  { %v334_v62 = vmul.f32 %v327_v61, %v586_v8 }
 0x3f1   :  { %v336_v63 = vsel %vm59_vm2, %v334_v62, 0.0 }
 0x3f2   :  { %v337_v0 = vrot.slane %v336_v63, 4  ;;  %v332_v1 = vpop.permute.xlu0 %331 }
 0x3f3   :  { %v335_v2 = vmul.f32 %v332_v1, %v595_v10 }
 0x3f4   :  { %v338_v3 = vadd.f32 %v337_v0, %v336_v63 }
 0x3f5   :  { %v343_v4 = vsel %vm59_vm2, %v335_v2, 0.0 }
 0x3f6   :  { %v339_v5 = vrot.slane %v338_v3, 2  ;;  %v344_v6 = vrot.slane %v343_v4, 4 }
 0x3f8   :  { %v340_v7 = vadd.f32 %v339_v5, %v338_v3  ;;  %v345_v9 = vadd.f32 %v344_v6, %v343_v4 }
 0x3fa   :  { %v346_v11 = vrot.slane %v345_v9, 2  ;;  %v341_v12 = vrot.slane %v340_v7, 1 }
 0x3fc   :  { %v347_v13 = vadd.f32 %v346_v11, %v345_v9  ;;  %v342_v8 = vadd.f32 %v341_v12, %v340_v7 }
 0x3fe   :  { %v348_v14 = vrot.slane %v347_v13, 1 }
 0x400   :  { %v349_v15 = vadd.f32 %v348_v14, %v347_v13 }
 0x402   :  { %v352_v16 = vsel %vm265_vm3, %v349_v15, %v342_v8 }
 0x403   :  { %355 = vst.msk [vmem:[#allocation7] sm:$0x3] %vm354_vm5, %v352_v16 }
 0x404   :  { %487 = shalt.err (!%p484_p6)
}
 0x405   :  { %s488_s14 = scalar_lea.hbm %s634_s6, 32 }
 0x406   :  { %p489_p7 = scmp.ne.s32.totalorder %s634_s6, %s488_s14  ;;  %p492_p8 = scmp.lt.u32.totalorder %s488_s14, %s634_s6 }
 0x408   :  { %p494_p9 = pnand %p492_p8, %p489_p7 }
 0x40a   :  { %497 = shalt.err (!%p494_p9)
}
 0x40b   :  { %365 = dma.vmem_to_hbm [thread:$0]  %s363_s5, 32, %s634_s6, [#allocation4]  }
 0x40c   :  { %502 = dma.done.wait [#allocation4], 32  }
 0x40d   :  { %503 = vsyncadd [#allocation4], 4294967264 }
 0x40e   :  { %369 = vsyncpa [#allocation3], 1 }
 0x40f   :  { %370 = vsyncpa [#allocation6], 1 }
 0x410   :  { %371 = vsyncpa [#allocation4], 1 }

</bundles_post_ra>
